<compile_context>
chip_gen: v7x
topology: tpu7x:2x2x1
jax: 0.10.0
libtpu: 0.0.40
codegen_flags: <defaults>
</compile_context>

<pallas_src>
import math

import jax
import jax.numpy as jnp
from jax.experimental import pallas as pl
from jax.experimental.pallas import tpu as pltpu


_TILE_BYTES_BUDGET = 4 << 20  # bytes per single tile; pipelined footprint ~6x this


def _round_up(x, m):
    return ((x + m - 1) // m) * m


def _glu_kernel(a_ref, b_ref, o_ref):
    # a_ref / b_ref / o_ref: (TR, TH) lane-dense tiles.
    a = a_ref[...]
    b = b_ref[...].astype(jnp.float32)
    # sigmoid(b) == 0.5 * (tanh(b / 2) + 1): EUP-friendly (tanh slot has slack),
    # no exp overflow, no full-precision VPU divide chain.
    s = 0.5 * (jnp.tanh(0.5 * b) + 1.0)
    o_ref[...] = (a * s.astype(a.dtype)).astype(o_ref.dtype)


def _select_tiles(rows, h, itemsize, row_tile, feat_tile):
    """Pick (tr, th): lane-dense, sublane-aligned tiles whose pipelined
    footprint (6 x tile_bytes) stays well under every generation's VMEM, with
    >= 2 grid blocks whenever the shape allows (v7x has 2 TensorCores)."""
    sub = max(8, 32 // itemsize)  # sublane quantum: f32 -> 8, bf16 -> 16, int8 -> 32
    budget = max(_TILE_BYTES_BUDGET // itemsize, sub * 128)  # elements per tile

    # Feature tile: prefer the full H (single contiguous writeback per row tile).
    fcap = feat_tile if feat_tile is not None else h
    if h <= fcap and h * sub <= budget:
        th = h
    else:
        th = 128
        for cand in (2048, 1024, 512, 256):
            if cand <= fcap and h % cand == 0 and cand * sub <= budget:
                th = cand
                break
    nfb = h // th

    # Row tile: biggest sublane-aligned value within the byte budget / user cap.
    rcap = row_tile if row_tile is not None else 1024
    tr = min(_round_up(rows, sub), max(sub, rcap), max(sub, (budget // th) // sub * sub))
    tr = max(sub, (tr // sub) * sub)

    # Avoid a nearly-empty tail block: prefer a nearby tr that divides rows.
    if rows > tr and rows % tr != 0:
        for cand in range(tr, max(sub, tr // 2) - 1, -sub):
            if rows % cand == 0:
                tr = cand
                break

    # Megacore: guarantee >= 2 grid blocks when the shape can be split.
    if pl.cdiv(rows, tr) * nfb < 2:
        if rows > sub:
            tr = max(sub, _round_up(pl.cdiv(rows, 2), sub))
        elif th > 128:
            th = th // 2 if (th // 2) % 128 == 0 else 128

    return tr, th


def _glu_call(a_arr, b_arr, rows, h, tr, th, b_block_off, out_dtype):
    """Lane-aligned GLU over 2-D operands: out[i, j] = a[i, j] * sigmoid(b[i, j]).

    `b_block_off` lets 'b' tiles come from the same array as 'a' tiles, offset
    by H columns (b_block_off = H // th), or from a separate array (0)."""
    grid_r = pl.cdiv(rows, tr)
    nfb = h // th
    itemsize = jnp.dtype(out_dtype).itemsize
    tile_bytes = tr * th * itemsize
    # 2 inputs + 1 output, double-buffered, plus headroom.
    vmem_limit = int(min(max(6 * tile_bytes + (4 << 20), 16 << 20), 48 << 20))

    cost = pl.CostEstimate(
        flops=4 * rows * h,
        transcendentals=rows * h,
        bytes_accessed=3 * rows * h * itemsize,
    )

    return pl.pallas_call(
        _glu_kernel,
        out_shape=jax.ShapeDtypeStruct((rows, h), out_dtype),
        grid_spec=pltpu.PrefetchScalarGridSpec(
            num_scalar_prefetch=0,
            grid=(grid_r, nfb),
            in_specs=[
                # 'a' tiles: columns [j*th, (j+1)*th)
                pl.BlockSpec((tr, th), lambda i, j: (i, j)),
                # 'b' tiles: same tile shape, offset by b_block_off blocks
                pl.BlockSpec((tr, th), lambda i, j, _off=b_block_off: (i, j + _off)),
            ],
            out_specs=pl.BlockSpec((tr, th), lambda i, j: (i, j)),
        ),
        compiler_params=pltpu.CompilerParams(
            dimension_semantics=("parallel", "parallel"),
            vmem_limit_bytes=vmem_limit,
        ),
        cost_estimate=cost,
    )(a_arr, b_arr)


def glu(x, *, row_tile=None, feat_tile=None):
    """x: (..., 2H) -> (..., H), computed as a * sigmoid(b)."""
    *lead, two_h = x.shape
    assert two_h % 2 == 0, "last dim must be even for GLU"
    h = two_h // 2
    rows = math.prod(lead) if lead else 1
    x2d = x.reshape(rows, two_h)
    itemsize = jnp.dtype(x.dtype).itemsize

    if h % 128 == 0:
        # Lane-aligned: pass x2d twice, b tiles offset by H columns (disjoint
        # reads, no wrapper-side copies).
        tr, th = _select_tiles(rows, h, itemsize, row_tile, feat_tile)
        out2d = _glu_call(x2d, x2d, rows, h, tr, th,
                          b_block_off=h // th, out_dtype=x.dtype)
    else:
        # Misaligned H: pad each half up to a 128-multiple in the wrapper and
        # route through the same lane-aligned kernel (avoids per-tile unaligned
        # lane slices and masked sub-128 stores). Pad of b feeds sigmoid but is
        # multiplied by zero-padded a and sliced away.
        h_pad = _round_up(h, 128)
        pad = h_pad - h
        a = jnp.pad(x2d[:, :h], ((0, 0), (0, pad)))
        b = jnp.pad(x2d[:, h:], ((0, 0), (0, pad)))
        tr, th = _select_tiles(rows, h_pad, itemsize, row_tile, feat_tile)
        out2d = _glu_call(a, b, rows, h_pad, tr, th,
                          b_block_off=0, out_dtype=x.dtype)[:, :h]

    return out2d.reshape(*lead, h)


def _ref_glu(x):
    a, b = jnp.split(x, 2, axis=-1)
    return a * jax.nn.sigmoid(b)


if __name__ == "__main__":
    key = jax.random.PRNGKey(0)
    k1, k2, k3 = jax.random.split(key, 3)

    # Small, misaligned-H shape from the module (exercises the padded path).
    B, S, H = 2, 8, 32  # input last dim = 2*H = 64
    x_small = jax.random.normal(k1, (B, S, 2 * H), dtype=jnp.float32)
    out_small = glu(x_small)
    jax.block_until_ready(out_small)
    assert out_small.shape == (B, S, H)
    assert jnp.allclose(out_small, _ref_glu(x_small), atol=1e-5, rtol=1e-5)

    # Small lane-aligned shape (two-spec lane-dense path, H//th = 1, split rows
    # so the grid has >= 2 blocks).
    H2 = 256  # input last dim = 512
    x_aligned = jax.random.normal(k2, (B, S, 2 * H2), dtype=jnp.float32)
    out_aligned = glu(x_aligned)
    jax.block_until_ready(out_aligned)
    assert out_aligned.shape == (B, S, H2)
    assert jnp.allclose(out_aligned, _ref_glu(x_aligned), atol=1e-5, rtol=1e-5)

    # Slightly larger aligned shape: full-H feature tile + multi-row-tile grid.
    B3, S3, H3 = 4, 64, 512  # input last dim = 1024
    x_mid = jax.random.normal(k3, (B3, S3, 2 * H3), dtype=jnp.float32)
    out_mid = glu(x_mid)
    jax.block_until_ready(out_mid)
    assert out_mid.shape == (B3, S3, H3)
    assert jnp.allclose(out_mid, _ref_glu(x_mid), atol=1e-5, rtol=1e-5)

    print("KERNEL_OK")
</pallas_src>

<mosaic_0001>
module attributes {stable_mosaic.version = 11 : i64} {
  func.func @_glu_kernel(%arg0: i32, %arg1: i32, %arg2: memref<8x128xf32, #tpu.memory_space<vmem>>, %arg3: memref<8x128xf32, #tpu.memory_space<vmem>>, %arg4: memref<8x128xf32, #tpu.memory_space<vmem>>) attributes {dimension_semantics = [#tpu.dimension_semantics<parallel>, #tpu.dimension_semantics<parallel>], iteration_bounds = array<i64: 2, 1>, scalar_prefetch = 0 : i64, scratch_operands = 0 : i64, tpu.core_type = #tpu.core_type<tc>, window_params = [{transform_indices = @transform_0, window_bounds = array<i64: 8, 128>}, {transform_indices = @transform_1, window_bounds = array<i64: 8, 128>}, {transform_indices = @transform_2, window_bounds = array<i64: 8, 128>}]} {
    %c0 = arith.constant 0 : index
    %c0_0 = arith.constant 0 : index
    %0 = vector.load %arg2[%c0, %c0_0] : memref<8x128xf32, #tpu.memory_space<vmem>>, vector<8x128xf32>
    %c0_1 = arith.constant 0 : index
    %c0_2 = arith.constant 0 : index
    %1 = vector.load %arg3[%c0_1, %c0_2] : memref<8x128xf32, #tpu.memory_space<vmem>>, vector<8x128xf32>
    %cst = arith.constant 5.000000e-01 : f32
    %2 = vector.broadcast %cst : f32 to vector<8x128xf32>
    %3 = arith.mulf %2, %1 : vector<8x128xf32>
    %4 = math.tanh %3 : vector<8x128xf32>
    %cst_3 = arith.constant 1.000000e+00 : f32
    %5 = vector.broadcast %cst_3 : f32 to vector<8x128xf32>
    %6 = arith.addf %4, %5 : vector<8x128xf32>
    %cst_4 = arith.constant 5.000000e-01 : f32
    %7 = vector.broadcast %cst_4 : f32 to vector<8x128xf32>
    %8 = arith.mulf %7, %6 : vector<8x128xf32>
    %9 = arith.mulf %0, %8 : vector<8x128xf32>
    %c0_5 = arith.constant 0 : index
    %c0_6 = arith.constant 0 : index
    %10 = vector.load %arg4[%c0_5, %c0_6] : memref<8x128xf32, #tpu.memory_space<vmem>>, vector<8x128xf32>
    tpu.vector_store %arg4[%c0_5, %c0_6], %9 {strides = array<i32>} : memref<8x128xf32, #tpu.memory_space<vmem>>, vector<8x128xf32>,
    return
  }
  func.func @transform_0(%arg0: i32, %arg1: i32) -> (i32, i32) {
    %c0_i32 = arith.constant 0 : i32
    return %arg0, %arg1 : i32, i32
  }
  func.func @transform_1(%arg0: i32, %arg1: i32) -> (i32, i32) {
    %c0_i32 = arith.constant 0 : i32
    %0 = arith.addi %arg1, %c0_i32 : i32
    %c0_i32_0 = arith.constant 0 : i32
    return %arg0, %0 : i32, i32
  }
  func.func @transform_2(%arg0: i32, %arg1: i32) -> (i32, i32) {
    %c0_i32 = arith.constant 0 : i32
    return %arg0, %arg1 : i32, i32
  }
}

</mosaic_0001>

<bundles_post_ra>
// kernel: tpu_custom_call.1
= control target key start
LH: loop header
LB: loop body
LE: loop exit
PB: predicated region body
PF: predicated region fallthrough
CT: control target
= control target key end

     0   :  { %7 = vsyncpa [#allocation3], 0  ;;  %s814_s0 = inlined_call_operand.hbm [shape: f32[16,128], index: 0, kind: input, shape index: {}]   ;;  %s815_s1 = inlined_call_operand.hbm [shape: f32[16,128], index: 1, kind: input, shape index: {}]   ;;  %s816_s2 = inlined_call_operand.hbm [shape: f32[16,128], index: 2, kind: output, shape index: {}]  }
   0x1   :  { %9 = vsyncpa [#allocation3 + $0x1], 0 }
   0x2   :  { %10 = vsyncpa [#allocation6], 0 }
   0x3   :  { %12 = vsyncpa [#allocation6 + $0x1], 0 }
   0x4   :  { %13 = vsyncpa [#allocation4], 0 }
   0x5   :  { %15 = vsyncpa [#allocation4 + $0x1], 0  ;;  %s594_s9 = smov 0   ;;  %s596_s10 = smov 0  }
   0x6   :  { %s598_s11 = smov 0   ;;  %s600_s12 = smov 0  }
   0x7   :  { %s602_s13 = smov 0   ;;  %s604_s14 = smov 0  }
   0x8 LB: > { %s343_s15 = sadd.s32 4294967295, %s574_s14   ;;  %s344_s16 = sadd.s32 4294967294, %s574_s14   ;;  %s574_s14 = sphi %s604_s14, %s21_s14   ;;  %s570_s13 = sphi %s602_s13, %s836_s13   ;;  %s566_s12 = sphi %s600_s12, %s835_s12   ;;  %s562_s11 = sphi %s598_s11, %s834_s11   ;;  %s558_s10 = sphi %s596_s10, %s833_s10   ;;  %s554_s9 = sphi %s594_s9, %s832_s9  }
   0x9   : > { %s33_s17 = sadd.s32 1, %s570_s13  ;;  %s42_s18 = sadd.s32 1, %s562_s11 }
   0xa   : > { %p35_p0 = scmp.ge.s32.totalorder %s33_s17, 2  ;;  %p49_p1 = scmp.ne.s32.totalorder %s562_s11, %s558_s10 }
   0xb   : > { %p50_p2 = scmp.eq.s32.totalorder %s574_s14, 0  ;;  %p55_p3 = scmp.ne.s32.totalorder %s558_s10, %s554_s9 }
   0xc   : > { %s838_s17 = smov (%p35_p0, %s33_s17), 0  ;;  %p56_p5 = scmp.eq.s32.totalorder %s343_s15, 0 }
   0xd   : > { %p635_p4 = por %p50_p2, %p49_p1  ;;  %s37_s20 = ssub.s32 %s570_s13, %s838_s17 }
   0xe   : > { %p109_p6 = scmp.eq.s32.totalorder %s343_s15, 1  ;;  %p40_p7 = scmp.eq.s32.totalorder %s37_s20, 0 }
   0xf   : > { %p641_p8 = por %p56_p5, %p55_p3  ;;  %p115_p10 = scmp.eq.s32.totalorder %s344_s16, 1 }
  0x10   : > { %p645_p9 = por %p109_p6, %p49_p1  ;;  %p376_p13 = scmp.lt.s32.totalorder %s574_s14, 2 }
  0x11   : > { %s820_s21 = scalar_select %p641_p8, 1, 0 }
  0x12   : > { %s821_s22 = scalar_select %p645_p9, 1, 0 }
  0x13   : > { %s650_s23 = scalar_select %p40_p7, %s562_s11, %s42_s18  }
  0x14   : > { %p652_p11 = por %p115_p10, %p55_p3  ;;  %s659_s25 = sand.u32 1, %s562_s11  }
  0x15   : > { %s347_s26 = sshll.u32 %s659_s25, 3  ;;  %s348_s27 = sshll.u32 %s570_s13, 7 }
  0x16   : > { %s822_s24 = scalar_select %p652_p11, 1, 0 }
  0x17   : > { %s668_s30 = scalar_lea.hbm %s814_s0, %s348_s27  ;;  %s139_s3 = scalar_lea.vmem [#allocation2], %s347_s26 }
  0x18   : > { %s147_s4 = sshll.u32 %s139_s3, 4  ;;  %p676_p0 = pnand %p376_p13, %p635_p4  ;;  %s672_s4 = int_to_ptr.vmem [resolvable:$true] %s147_s4 }
  0x19   : > { %s136_s6 = scalar_lea.sflag [#allocation3], %s659_s25  ;;  %s428_s7 = scalar_lea.hbm %s668_s30, 128 }
  0x1a   : > { %p429_p3 = scmp.ne.s32.totalorder %s668_s30, %s428_s7  ;;  %p430_p5 = pneg %p676_p0 }
  0x1b   : > { %s433_s16 = scalar_lea.hbm %s814_s0, 256  ;;  %p434_p4 = scmp.lt.u32.totalorder %s668_s30, %s814_s0 }
  0x1c   : > { %p431_p6 = pnand %p430_p5, %p429_p3  ;;  %p435_p10 = scmp.lt.u32.totalorder %s433_s16, %s428_s7 }
  0x1d   : > { %p437_p12 = scmp.lt.u32.totalorder %s428_s7, %s668_s30 }
  0x1e   : > { %p432_p7 = pneg %p431_p6  ;;  %p436_p13 = por %p435_p10, %p434_p4 }
  0x20   : > { %p438_p1 = por %p437_p12, %p436_p13 }
  0x22   : > { %p439_p2 = pnand %p438_p1, %p432_p7 }
  0x24   : > { %442 = shalt.err (!%p439_p2)
}
  0x25   : > { %s443_s20 = scalar_lea.vmem %s672_s4, 128  ;;  %s576_s28 = smov [#allocation2]  }
  0x26   : > { %p444_p3 = scmp.ne.s32.totalorder %s672_s4, %s443_s20  ;;  %s448_s29 = sshll.u32 %s576_s28, 4  ;;  %s449_s29 = int_to_ptr.vmem [resolvable:$false] %s448_s29 }
  0x27   : > { %s450_s3 = scalar_lea.vmem %s449_s29, 256  ;;  %p451_p9 = scmp.lt.s32.totalorder %s672_s4, %s449_s29 }
  0x28   : > { %p446_p6 = pnand %p444_p3, %p430_p5  ;;  %p452_p4 = scmp.lt.s32.totalorder %s450_s3, %s443_s20 }
  0x2a   : > { %p447_p11 = pneg %p446_p6  ;;  %p453_p10 = por %p452_p4, %p451_p9 }
  0x2c   : > { %p454_p12 = pnand %p453_p10, %p447_p11 }
  0x2e   : > { %457 = shalt.err (!%p454_p12)
}
  0x2f   : > { %368 = dma.hbm_to_vmem [thread:$0]  (!%p676_p0), %s668_s30, 128, %s672_s4, %s136_s6  }
  0x30   : > { %p824_p1 = scmp.lt.s32.totalorder %s574_s14, 3  ;;  %p825_p2 = scmp.ge.s32.totalorder %s574_s14, 1 }
  0x31   : > { %s721_s16 = scalar_lea.hbm %s815_s1, %s348_s27  ;;  %s158_s18 = scalar_lea.vmem [#allocation5], %s347_s26 }
  0x32   : > { %p712_p7 = pnand %p825_p2, %p824_p1  ;;  %s166_s19 = sshll.u32 %s158_s18, 4  ;;  %s167_s19 = int_to_ptr.vmem [resolvable:$true] %s166_s19 }
  0x33   : > { %s155_s30 = scalar_lea.sflag [#allocation6], %s659_s25  ;;  %s458_s4 = scalar_lea.hbm %s721_s16, 128 }
  0x34   : > { %s826_s7 = scalar_select %p712_p7, 1, 0 }
  0x35   : > { %p459_p9 = scmp.ne.s32.totalorder %s721_s16, %s458_s4  ;;  %s463_s27 = scalar_lea.hbm %s815_s1, 256 }
  0x36   : > { %p464_p3 = scmp.lt.u32.totalorder %s721_s16, %s815_s1  ;;  %p465_p6 = scmp.lt.u32.totalorder %s463_s27, %s458_s4 }
  0x37   : > { %p461_p11 = pnand %p459_p9, %p430_p5  ;;  %p467_p10 = scmp.lt.u32.totalorder %s458_s4, %s721_s16 }
  0x38   : > { %p466_p4 = por %p465_p6, %p464_p3 }
  0x39   : > { %p462_p13 = pneg %p461_p11 }
  0x3a   : > { %p468_p12 = por %p467_p10, %p466_p4 }
  0x3c   : > { %p469_p1 = pnand %p468_p12, %p462_p13 }
  0x3e   : > { %472 = shalt.err (!%p469_p1)
}
  0x3f   : > { %s473_s25 = scalar_lea.vmem %s167_s19, 128  ;;  %s577_s26 = smov [#allocation5]  }
  0x40   : > { %p474_p2 = scmp.ne.s32.totalorder %s167_s19, %s473_s25  ;;  %s478_s3 = sshll.u32 %s577_s26, 4  ;;  %s479_s3 = int_to_ptr.vmem [resolvable:$false] %s478_s3 }
  0x41   : > { %s480_s8 = scalar_lea.vmem %s479_s3, 256  ;;  %p481_p8 = scmp.lt.s32.totalorder %s167_s19, %s479_s3 }
  0x42   : > { %p476_p9 = pnand %p474_p2, %p430_p5  ;;  %p482_p7 = scmp.lt.s32.totalorder %s480_s8, %s473_s25 }
  0x44   : > { %p477_p11 = pneg %p476_p9  ;;  %p483_p3 = por %p482_p7, %p481_p8 }
  0x46   : > { %p484_p6 = pnand %p483_p3, %p477_p11 }
  0x48   : > { %487 = shalt.err (!%p484_p6)
}
  0x49   : > { %371 = dma.hbm_to_vmem [thread:$0]  (!%p676_p0), %s721_s16, 128, %s167_s19, %s155_s30  }
  0x4a   : > { %p827_p13 = scmp.ne.s32.totalorder %s826_s7, 0 }
  0x4b   : > { %s748_s15 = sand.u32 (!%p827_p13), 1, %s558_s10   ;;  %p828_p5 = scmp.ne.s32.totalorder (!%p827_p13), %s820_s21, 0 }
  0x4c   : > { %175 = sbr.rel (%p827_p13) target bundleno = 120 (0x78), region = 28  ;;  %s352_s18 = sshll.u32 (!%p827_p13), %s748_s15, 3 }
  0x4d   : > { %s178_s4 = scalar_lea.sflag (!%p827_p13), [#allocation3], %s748_s15  ;;  %s181_s6 = scalar_lea.vmem (!%p827_p13), [#allocation2], %s352_s18 }
  0x53   : > { %541 = dma.done.wait (%p828_p5), %s178_s4, 128  }
  0x54   : > { %543 = vsyncadd (%p828_p5), %s178_s4, 4294967168  ;;  %s187_s5 = scalar_lea.sflag [#allocation6], %s748_s15  ;;  %s190_s16 = scalar_lea.vmem [#allocation5], %s352_s18 }
  0x55   : > { %545 = dma.done.wait (%p828_p5), %s187_s5, 128  }
  0x56   : > { %547 = vsyncadd (%p828_p5), %s187_s5, 4294967168  ;;  %v217_v0 = vld [vmem:[%s190_s16] sm:$0xff]  ;;  %v216_v4 = vld [vmem:[%s181_s6] sm:$0xff]  ;;  %s215_s7 = scalar_lea.vmem [#allocation7], %s352_s18  ;;  %s356_s30 = sshll.u32 %s566_s12, 7 }
  0x57   : > { %v218_v1 = vmul.f32 0.5, %v217_v0  ;;  %s239_s19 = sshll.u32 %s215_s7, 4  ;;  %s767_s21 = scalar_lea.hbm %s816_s2, %s356_s30  ;;  %s762_s19 = int_to_ptr.vmem [resolvable:$true] %s239_s19 }
  0x58   : > { %s225_s28 = scalar_lea.sflag [#allocation4], %s748_s15  ;;  %s488_s29 = scalar_lea.vmem %s762_s19, 128 }
  0x59   : > { %426 = vtanh.f32 %v218_v1  ;;  %p489_p8 = scmp.ne.s32.totalorder %s762_s19, %s488_s29  ;;  %p829_p0 = scmp.ne.s32.totalorder %s821_s22, 0 }
  0x5a   : > { %s578_s12 = smov [#allocation7]  }
  0x5b   : > { %p490_p7 = pnand %p489_p8, %p829_p0  ;;  %s492_s25 = sshll.u32 %s578_s12, 4  ;;  %s493_s25 = int_to_ptr.vmem [resolvable:$false] %s492_s25 }
  0x5c   : > { %s494_s26 = scalar_lea.vmem %s493_s25, 256  ;;  %p495_p10 = scmp.lt.s32.totalorder %s762_s19, %s493_s25 }
  0x5d   : > { %p491_p4 = pneg %p490_p7  ;;  %p496_p12 = scmp.lt.s32.totalorder %s494_s26, %s488_s29 }
  0x5f   : > { %p497_p1 = por %p496_p12, %p495_p10 }
  0x61   : > { %p498_p2 = pnand %p497_p1, %p491_p4 }
  0x63   : > { %v427_v2 = vpop.eup %426 }
  0x64   : > { %v220_v3 = vadd.f32 1.0, %v427_v2 }
  0x66   : > { %v221_v5 = vmul.f32 0.5, %v220_v3 }
  0x68   : > { %v222_v6 = vmul.f32 %v221_v5, %v216_v4 }
  0x6a   : > { %223 = vst [vmem:[%s215_s7] sm:$0xff] %v222_v6 }
  0x6b   : > { %501 = shalt.err (!%p498_p2)
}
  0x6c   : > { %s502_s3 = scalar_lea.hbm %s767_s21, 128  ;;  %s506_s18 = scalar_lea.hbm %s816_s2, 256 }
  0x6d   : > { %p503_p9 = scmp.ne.s32.totalorder %s767_s21, %s502_s3  ;;  %p507_p6 = scmp.lt.u32.totalorder %s767_s21, %s816_s2 }
  0x6e   : > { %p508_p13 = scmp.lt.u32.totalorder %s506_s18, %s502_s3  ;;  %p510_p8 = scmp.lt.u32.totalorder %s502_s3, %s767_s21 }
  0x6f   : > { %p504_p11 = pnand %p503_p9, %p829_p0 }
  0x70   : > { %p509_p5 = por %p508_p13, %p507_p6 }
  0x71   : > { %p505_p3 = pneg %p504_p11 }
  0x72   : > { %p511_p7 = por %p510_p8, %p509_p5 }
  0x74   : > { %p512_p4 = pnand %p511_p7, %p505_p3 }
  0x76   : > { %515 = shalt.err (!%p512_p4)
}
  0x77   : > { %363 = dma.vmem_to_hbm [thread:$0]  (%p829_p0), %s762_s19, 128, %s767_s21, %s225_s28  }
  0x78 PF: > { %s251_s5 = sand.u32 1, %s554_s9   ;;  %p830_p10 = scmp.ne.s32.totalorder %s822_s24, 0 }
  0x79   : > { %p831_p12 = scmp.ge.s32.totalorder %s574_s14, 2  ;;  %s252_s16 = scalar_lea.sflag [#allocation4], %s251_s5 }
  0x7b   : > { %p373_p1 = pnand %p831_p12, %p830_p10 }
  0x7d   : > { %549 = dma.done.wait (!%p373_p1), %s252_s16, 128  }
  0x7e   : > { %551 = vsyncadd (!%p373_p1), %s252_s16, 4294967168  ;;  %s21_s14 = sadd.s32 1, %s574_s14   ;;  %s832_s9 = smov %s558_s10 }
  0x7f   : > { %p18_p2 = scmp.ge.s32.totalorder %s21_s14, 4   ;;  %s833_s10 = smov %s562_s11 }
  0x80   : > { %s834_s11 = smov %s650_s23  ;;  %s835_s12 = smov %s570_s13 }
  0x81   : > { %s836_s13 = smov %s838_s17  ;;  %20 = sbr.rel (!%p18_p2) target bundleno = 8 (0x8), region = 86 }
  0x88   :  { %257 = vsyncpa [#allocation3], 1 }
  0x89   :  { %259 = vsyncpa [#allocation3 + $0x1], 1 }
  0x8a   :  { %260 = vsyncpa [#allocation6], 1 }
  0x8b   :  { %262 = vsyncpa [#allocation6 + $0x1], 1 }
  0x8c   :  { %263 = vsyncpa [#allocation4], 1 }
  0x8d   :  { %265 = vsyncpa [#allocation4 + $0x1], 1 }

</bundles_post_ra>
